<compile_context>
chip_gen: v6e
topology: v6e:2x2x1
jax: 0.10.0
libtpu: 0.0.40
codegen_flags: <defaults>
</compile_context>

<pallas_src>
import jax
import jax.numpy as jnp
from jax.experimental import pallas as pl
from jax.experimental.pallas import tpu as pltpu


def _round_up(a, m):
    return ((a + m - 1) // m) * m


def _round_down(a, m):
    return (a // m) * m


def _sublane_multiple(dtype):
    # f32 -> 8, bf16 -> 16, int8/fp8 -> 32 (sub-32-bit dtypes pack along sublanes).
    return max(8, 32 // jnp.dtype(dtype).itemsize)


def film_kernel(gb_ref, x_ref, o_ref):
    # gb_ref: (2, TR, 1) f32 -- [0] = gamma, [1] = beta, one value per (b, c) row
    # x_ref / o_ref: (TR, TL) -- lane-dense tile of the flattened activations
    gamma = gb_ref[0]                               # (TR, 1) f32
    beta = gb_ref[1]                                # (TR, 1) f32
    x = x_ref[...].astype(jnp.float32)              # FMA in f32 (free: mem-bound)
    o_ref[...] = (gamma * x + beta).astype(o_ref.dtype)


def film_forward(x_nchw, condition, w_gamma, b_gamma, w_beta, b_beta):
    """x_nchw: (B, C, H, W); condition: (B, D); PyTorch-layout params:
    w_*: (C, D), b_*: (C,).  Returns (B, C, H, W) in x_nchw.dtype."""
    B, C, H, W = x_nchw.shape
    R, L = B * C, H * W
    itemsize = jnp.dtype(x_nchw.dtype).itemsize
    sub = _sublane_multiple(x_nchw.dtype)

    # ---- Projections hoisted out of the kernel: one fused matmul, f32 accumulate.
    w_cat = jnp.concatenate([w_gamma, w_beta], axis=0).astype(jnp.float32)   # (2C, D)
    b_cat = jnp.concatenate([b_gamma, b_beta], axis=0).astype(jnp.float32)   # (2C,)
    gb = condition.astype(jnp.float32) @ w_cat.T + b_cat                     # (B, 2C)
    gamma = gb[:, :C].reshape(R, 1)                                          # (R, 1) f32
    beta = gb[:, C:].reshape(R, 1)                                           # (R, 1) f32
    gb_packed = jnp.stack([gamma, beta], axis=0)                             # (2, R, 1) f32

    # ---- Lane-dense 2D layout: rows = B*C (sublanes), cols = H*W (lanes).
    x2d = x_nchw.reshape(R, L)        # contiguous reshape: free, no extra HBM pass

    # ---- Tiling.
    TILE_BYTES = 4 * 1024 * 1024      # per-tile cap (v7x sweet spot, fine on v5e/v6e)
    ROW_BYTES_FULL = 256 * 1024       # keep whole rows (contiguous DMA) up to this
    MIN_TILE_BYTES = 1 * 1024 * 1024  # don't split below this just for parallelism
    TARGET_STEPS = 8                  # >= ~4 grid steps per TensorCore on v7x

    row_bytes = L * itemsize
    if row_bytes <= ROW_BYTES_FULL:
        TL = L                                                        # uncut lane axis
    else:
        TL = max(128, _round_down(ROW_BYTES_FULL // itemsize, 128))   # large 128-multiple

    row_tile_bytes = TL * itemsize
    cap_rows = max(sub, _round_down(TILE_BYTES // row_tile_bytes, sub))
    rows_8_steps = _round_up(pl.cdiv(R, TARGET_STEPS), sub)
    rows_min_tile = max(sub, _round_down(MIN_TILE_BYTES // row_tile_bytes, sub))
    TR = min(cap_rows, max(rows_8_steps, rows_min_tile))
    if TR >= R:
        TR = R                         # single full-extent row block (no raggedness)

    grid = (pl.cdiv(R, TR), pl.cdiv(L, TL))   # rows outer, lanes inner

    out2d = pl.pallas_call(
        film_kernel,
        out_shape=jax.ShapeDtypeStruct((R, L), x_nchw.dtype),
        grid=grid,
        in_specs=[
            pl.BlockSpec((2, TR, 1), lambda i, j: (0, i, 0)),   # gamma/beta column (f32)
            pl.BlockSpec((TR, TL), lambda i, j: (i, j)),        # x tile
        ],
        out_specs=pl.BlockSpec((TR, TL), lambda i, j: (i, j)),
        compiler_params=pltpu.CompilerParams(
            dimension_semantics=("parallel", "parallel"),
            vmem_limit_bytes=48 * 1024 * 1024,
        ),
        # TODO(synk): add input_output_aliases={1: 0} when callers can donate x
        # (halves HBM footprint; traffic unchanged).
    )(gb_packed, x2d)

    return out2d.reshape(B, C, H, W)


if __name__ == "__main__":
    # Small shapes: batch=2, num_features(C)=4, spatial=16x16, condition_dim=32
    B, C, H, W, D = 2, 4, 16, 16, 32

    key = jax.random.PRNGKey(0)
    kx, kc, kwg, kbg, kwb, kbb = jax.random.split(key, 6)

    x = jax.random.normal(kx, (B, C, H, W), dtype=jnp.float32)
    condition = jax.random.normal(kc, (B, D), dtype=jnp.float32)

    # Deterministic "Linear" parameters (PyTorch layout: weight (out, in), bias (out,))
    bound = 1.0 / (D ** 0.5)
    w_gamma = jax.random.uniform(kwg, (C, D), minval=-bound, maxval=bound, dtype=jnp.float32)
    b_gamma = jax.random.uniform(kbg, (C,), minval=-bound, maxval=bound, dtype=jnp.float32)
    w_beta = jax.random.uniform(kwb, (C, D), minval=-bound, maxval=bound, dtype=jnp.float32)
    b_beta = jax.random.uniform(kbb, (C,), minval=-bound, maxval=bound, dtype=jnp.float32)

    film = jax.jit(film_forward)
    out = jax.block_until_ready(film(x, condition, w_gamma, b_gamma, w_beta, b_beta))

    # Pure-JAX reference check (same semantics as the PyTorch module)
    gamma_ref = condition @ w_gamma.T + b_gamma        # (B, C)
    beta_ref = condition @ w_beta.T + b_beta           # (B, C)
    ref = gamma_ref[:, :, None, None] * x + beta_ref[:, :, None, None]

    assert out.shape == (B, C, H, W)
    assert jnp.allclose(out, ref, atol=1e-5, rtol=1e-5)
    print("KERNEL_OK")
</pallas_src>

<mosaic_0001>
module attributes {stable_mosaic.version = 11 : i64} {
  func.func @film_kernel(%arg0: i32, %arg1: i32, %arg2: memref<2x8x1xf32, #tpu.memory_space<vmem>>, %arg3: memref<8x256xf32, #tpu.memory_space<vmem>>, %arg4: memref<8x256xf32, #tpu.memory_space<vmem>>) attributes {dimension_semantics = [#tpu.dimension_semantics<parallel>, #tpu.dimension_semantics<parallel>], iteration_bounds = array<i64: 1, 1>, scalar_prefetch = 0 : i64, scratch_operands = 0 : i64, tpu.core_type = #tpu.core_type<tc>, window_params = [{transform_indices = @transform_0, window_bounds = array<i64: 2, 8, 1>}, {transform_indices = @transform_1, window_bounds = array<i64: 8, 256>}, {transform_indices = @transform_2, window_bounds = array<i64: 8, 256>}]} {
    %c0 = arith.constant 0 : index
    %c0_0 = arith.constant 0 : index
    %c0_1 = arith.constant 0 : index
    %0 = vector.load %arg2[%c0, %c0_0, %c0_1] : memref<2x8x1xf32, #tpu.memory_space<vmem>>, vector<1x8x1xf32>
    %1 = vector.shape_cast %0 : vector<1x8x1xf32> to vector<8x1xf32>
    %c1 = arith.constant 1 : index
    %c0_2 = arith.constant 0 : index
    %c0_3 = arith.constant 0 : index
    %2 = vector.load %arg2[%c1, %c0_2, %c0_3] : memref<2x8x1xf32, #tpu.memory_space<vmem>>, vector<1x8x1xf32>
    %3 = vector.shape_cast %2 : vector<1x8x1xf32> to vector<8x1xf32>
    %c0_4 = arith.constant 0 : index
    %c0_5 = arith.constant 0 : index
    %4 = vector.load %arg3[%c0_4, %c0_5] : memref<8x256xf32, #tpu.memory_space<vmem>>, vector<8x256xf32>
    %5 = vector.broadcast %1 : vector<8x1xf32> to vector<8x256xf32>
    %6 = arith.mulf %5, %4 : vector<8x256xf32>
    %7 = vector.broadcast %3 : vector<8x1xf32> to vector<8x256xf32>
    %8 = arith.addf %6, %7 : vector<8x256xf32>
    %c0_6 = arith.constant 0 : index
    %c0_7 = arith.constant 0 : index
    %9 = vector.load %arg4[%c0_6, %c0_7] : memref<8x256xf32, #tpu.memory_space<vmem>>, vector<8x256xf32>
    tpu.vector_store %arg4[%c0_6, %c0_7], %8 {strides = array<i32>} : memref<8x256xf32, #tpu.memory_space<vmem>>, vector<8x256xf32>,
    return
  }
  func.func @transform_0(%arg0: i32, %arg1: i32) -> (i32, i32, i32) {
    %c0_i32 = arith.constant 0 : i32
    %c0_i32_0 = arith.constant 0 : i32
    %c0_i32_1 = arith.constant 0 : i32
    return %c0_i32, %arg0, %c0_i32_0 : i32, i32, i32
  }
  func.func @transform_1(%arg0: i32, %arg1: i32) -> (i32, i32) {
    %c0_i32 = arith.constant 0 : i32
    return %arg0, %arg1 : i32, i32
  }
  func.func @transform_2(%arg0: i32, %arg1: i32) -> (i32, i32) {
    %c0_i32 = arith.constant 0 : i32
    return %arg0, %arg1 : i32, i32
  }
}

</mosaic_0001>

<bundles_post_ra>
// kernel: film_forward.1
= control target key start
LH: loop header
LB: loop body
LE: loop exit
PB: predicated region body
PF: predicated region fallthrough
CT: control target
= control target key end

     0   :  { %v39_v0 = vmov 0   ;;  %s73_s0 = inlined_call_operand.vmem [shape: f32[2,8,1], index: 0, kind: input, shape index: {}]   ;;  %s74_s1 = inlined_call_operand.vmem [shape: f32[8,256], index: 1, kind: input, shape index: {}]   ;;  %s75_s2 = inlined_call_operand.vmem [shape: f32[8,256], index: 2, kind: output, shape index: {}]  }
   0x1   :  { %38 = vset.pattern.permute.xlu0 %v39_v0  ;;  %v11_v1 = vld [vmem:[%s73_s0] sm:$0xff]  ;;  %v36_v2 = vld [vmem:[%s73_s0 + $0x8] sm:$0xff] }
   0x2   :  { %18 = vperm.xlu0 %38, %v11_v1   ;;  %v14_v3 = vld [vmem:[%s74_s1] sm:$0xff]  ;;  %v15_v4 = vld [vmem:[%s74_s1 + $0x8] sm:$0xff] }
   0x6   :  { %25 = vperm.xlu0 %38, %v36_v2  }
  0x7d   :  { %v19_v5 = vpop.permute.xlu0 %18 }
  0x7e   :  { %v21_v6 = vmul.f32 %v19_v5, %v14_v3  ;;  %v22_v7 = vmul.f32 %v19_v5, %v15_v4 }
  0x81   :  { %v26_v8 = vpop.permute.xlu0 %25 }
  0x82   :  { %v28_v9 = vadd.f32 %v26_v8, %v21_v6  ;;  %v29_v10 = vadd.f32 %v26_v8, %v22_v7 }
  0x84   :  { %30 = vst [vmem:[%s75_s2] sm:$0xff] %v28_v9  ;;  %31 = vst [vmem:[%s75_s2 + $0x8] sm:$0xff] %v29_v10 }

</bundles_post_ra>
